<compile_context>
chip_gen: v7x
topology: tpu7x:2x2x1
jax: 0.10.0
libtpu: 0.0.40
codegen_flags: <defaults>
</compile_context>

<pallas_src>
import jax
import jax.numpy as jnp
from jax.experimental import pallas as pl
from jax.experimental.pallas import tpu as pltpu

SIZE = 4
BOARD = SIZE ** 3          # 64
IN_DIM = BOARD + 1         # 65
HID = 128
OUT_DIM = SIZE ** 2        # 16
TM_MAX = 4096              # max batch-tile rows per grid step (multiple of 8)
VMEM_LIMIT_BYTES = 48 * 1024 * 1024


def _round_up(n, m):
    return ((n + m - 1) // m) * m


def _pick_tm(b):
    """Pick the batch-tile row count.

    - tiny batches: one block equal to the full batch (always a legal block).
    - otherwise: a multiple of 8, capped at TM_MAX, chosen so the grid has at
      least 2 steps (keeps both TensorCores busy on v7x via the "parallel"
      batch axis)."""
    if b <= 16:
        return b
    half = _round_up(pl.cdiv(b, 2), 8)
    return min(TM_MAX, half)


def _mlp_kernel(xb_ref, pid_ref, w1b_ref, w1p_ref, b1_ref,
                w2_ref, b2_ref, w3_ref, b3_ref, o_ref):
    """Fused 3-layer MLP on one batch tile.

    h1 = relu(x_board @ W1_board + pid * w1_pid + b1)
    h2 = relu(h1 @ W2 + b2)
    o  = h2 @ W3 + b3                  (true 16-lane output, no padding)

    Board activations arrive as raw f32 and are cast to bf16 here (VPU work,
    pure slack in a DMA-bound kernel); all matmuls run bf16 on the MXU with
    f32 accumulation.
    """
    xb = xb_ref[...].astype(jnp.bfloat16)                          # (tm, 64)
    h1 = jnp.dot(xb, w1b_ref[...], preferred_element_type=jnp.float32)
    h1 = h1 + pid_ref[...] * w1p_ref[...] + b1_ref[...]
    h1 = jnp.maximum(h1, 0.0)

    h2 = jnp.dot(h1.astype(jnp.bfloat16), w2_ref[...],
                 preferred_element_type=jnp.float32) + b2_ref[...]
    h2 = jnp.maximum(h2, 0.0)

    o_ref[...] = jnp.dot(h2.astype(jnp.bfloat16), w3_ref[...],
                         preferred_element_type=jnp.float32) + b3_ref[...]


def prepare_params(params):
    """One-time parameter prep: split W1 into board / player-id parts and cast
    the matmul weights to bf16.  W3/b3 are kept at their true (128,16)/(16,)
    shapes -- no lane padding."""
    w1, b1, w2, b2, w3, b3 = params
    w1_board = w1[:BOARD].astype(jnp.bfloat16)                     # (64, 128)
    w1_pid = w1[BOARD:].astype(jnp.float32)                        # (1, 128) exact f32 path
    w2_bf = w2.astype(jnp.bfloat16)                                # (128, 128)
    w3_bf = w3.astype(jnp.bfloat16)                                # (128, 16)
    return (w1_board, w1_pid,
            b1.reshape(1, HID).astype(jnp.float32),
            w2_bf, b2.reshape(1, HID).astype(jnp.float32),
            w3_bf, b3.reshape(1, OUT_DIM).astype(jnp.float32))


@jax.jit
def score_four_nn_forward(x, player_id, prepared):
    """x: (B, 4, 4, 4) float32, player_id: (B,) float32 -> (B, 16) float32."""
    w1_board, w1_pid, b1, w2, b2, w3, b3 = prepared

    b = x.shape[0]
    # Free row-major views -- no HBM copy, no dtype pre-pass, no padding.
    x_flat = x.reshape(-1, BOARD).astype(jnp.float32)              # (B, 64) f32
    pid = player_id.reshape(-1, 1).astype(jnp.float32)             # (B, 1)  f32

    tm = _pick_tm(b)
    grid = (pl.cdiv(b, tm),)   # ragged last tile handled by Pallas block masking

    flops = 2 * b * (BOARD * HID + HID * HID + HID * OUT_DIM)
    bytes_accessed = (b * (BOARD * 4 + 4 + OUT_DIM * 4)            # streamed acts + output
                      + w1_board.size * 2 + w1_pid.size * 4 + b1.size * 4
                      + w2.size * 2 + b2.size * 4
                      + w3.size * 2 + b3.size * 4)

    out = pl.pallas_call(
        _mlp_kernel,
        out_shape=jax.ShapeDtypeStruct((b, OUT_DIM), jnp.float32),
        grid_spec=pltpu.PrefetchScalarGridSpec(
            num_scalar_prefetch=0,
            grid=grid,
            in_specs=[
                pl.BlockSpec((tm, BOARD), lambda i: (i, 0)),       # board tile (streamed f32)
                pl.BlockSpec((tm, 1), lambda i: (i, 0)),           # player_id tile (streamed)
                pl.BlockSpec((BOARD, HID), lambda i: (0, 0)),      # W1_board (resident)
                pl.BlockSpec((1, HID), lambda i: (0, 0)),          # w1_pid row
                pl.BlockSpec((1, HID), lambda i: (0, 0)),          # b1
                pl.BlockSpec((HID, HID), lambda i: (0, 0)),        # W2
                pl.BlockSpec((1, HID), lambda i: (0, 0)),          # b2
                pl.BlockSpec((HID, OUT_DIM), lambda i: (0, 0)),    # W3 (unpadded, 128x16)
                pl.BlockSpec((1, OUT_DIM), lambda i: (0, 0)),      # b3 (unpadded)
            ],
            out_specs=pl.BlockSpec((tm, OUT_DIM), lambda i: (i, 0)),
        ),
        compiler_params=pltpu.CompilerParams(
            dimension_semantics=("parallel",),
            vmem_limit_bytes=VMEM_LIMIT_BYTES),
        cost_estimate=pl.CostEstimate(
            flops=flops, transcendentals=0, bytes_accessed=bytes_accessed),
    )(x_flat, pid, w1_board, w1_pid, b1, w2, b2, w3, b3)

    return out                                                     # (B, 16)


def init_params(key):
    """Deterministic init mimicking nn.Linear default (uniform(-1/sqrt(fan_in), ..))."""
    ks = jax.random.split(key, 6)

    def lin(kw, kb, fan_in, fan_out):
        bound = 1.0 / jnp.sqrt(fan_in)
        w = jax.random.uniform(kw, (fan_in, fan_out), jnp.float32, -bound, bound)
        bias = jax.random.uniform(kb, (fan_out,), jnp.float32, -bound, bound)
        return w, bias

    w1, b1 = lin(ks[0], ks[1], IN_DIM, HID)
    w2, b2 = lin(ks[2], ks[3], HID, HID)
    w3, b3 = lin(ks[4], ks[5], HID, OUT_DIM)
    return (w1, b1, w2, b2, w3, b3)


def _reference(x, player_id, params):
    """Pure-JAX f32 reference matching the PyTorch module exactly."""
    w1, b1, w2, b2, w3, b3 = params
    feats = jnp.concatenate(
        [x.reshape(-1, SIZE ** 3), player_id.reshape(-1, 1)], axis=1)
    h1 = jnp.maximum(feats @ w1 + b1, 0.0)
    h2 = jnp.maximum(h1 @ w2 + b2, 0.0)
    return h2 @ w3 + b3


if __name__ == "__main__":
    key = jax.random.PRNGKey(0)
    k_params, k_x, k_p = jax.random.split(key, 3)

    params = init_params(k_params)
    prepared = prepare_params(params)

    batch = 2
    # board occupancy values in {-1, 0, 1}, player id in {1, 2} (exact in bf16)
    x = jax.random.randint(k_x, (batch, SIZE, SIZE, SIZE), -1, 2).astype(jnp.float32)
    player_id = jax.random.randint(k_p, (batch,), 1, 3).astype(jnp.float32)

    out = score_four_nn_forward(x, player_id, prepared)
    out = jax.block_until_ready(out)

    ref = _reference(x, player_id, params)
    assert out.shape == (batch, OUT_DIM)
    # bf16 matmul operands -> ~1e-2-level differences vs f32 reference; relaxed tolerance.
    assert jnp.allclose(out, ref, atol=5e-2, rtol=5e-2), (out, ref)

    print("KERNEL_OK")
</pallas_src>

<mosaic_0001>
module attributes {stable_mosaic.version = 11 : i64} {
  func.func @_mlp_kernel(%arg0: i32, %arg1: memref<2x64xf32, #tpu.memory_space<vmem>>, %arg2: memref<2x1xf32, #tpu.memory_space<vmem>>, %arg3: memref<64x128xbf16, #tpu.memory_space<vmem>>, %arg4: memref<1x128xf32, #tpu.memory_space<vmem>>, %arg5: memref<1x128xf32, #tpu.memory_space<vmem>>, %arg6: memref<128x128xbf16, #tpu.memory_space<vmem>>, %arg7: memref<1x128xf32, #tpu.memory_space<vmem>>, %arg8: memref<128x16xbf16, #tpu.memory_space<vmem>>, %arg9: memref<1x16xf32, #tpu.memory_space<vmem>>, %arg10: memref<2x16xf32, #tpu.memory_space<vmem>>) attributes {dimension_semantics = [#tpu.dimension_semantics<parallel>], iteration_bounds = array<i64: 1>, scalar_prefetch = 0 : i64, scratch_operands = 0 : i64, tpu.core_type = #tpu.core_type<tc>, window_params = [{transform_indices = @transform_0, window_bounds = array<i64: 2, 64>}, {transform_indices = @transform_1, window_bounds = array<i64: 2, 1>}, {pipeline_mode = #tpu.pipeline_mode<synchronous>, transform_indices = @transform_2, window_bounds = array<i64: 64, 128>}, {pipeline_mode = #tpu.pipeline_mode<synchronous>, transform_indices = @transform_3, window_bounds = array<i64: 1, 128>}, {pipeline_mode = #tpu.pipeline_mode<synchronous>, transform_indices = @transform_4, window_bounds = array<i64: 1, 128>}, {pipeline_mode = #tpu.pipeline_mode<synchronous>, transform_indices = @transform_5, window_bounds = array<i64: 128, 128>}, {pipeline_mode = #tpu.pipeline_mode<synchronous>, transform_indices = @transform_6, window_bounds = array<i64: 1, 128>}, {pipeline_mode = #tpu.pipeline_mode<synchronous>, transform_indices = @transform_7, window_bounds = array<i64: 128, 16>}, {pipeline_mode = #tpu.pipeline_mode<synchronous>, transform_indices = @transform_8, window_bounds = array<i64: 1, 16>}, {transform_indices = @transform_9, window_bounds = array<i64: 2, 16>}]} {
    %c0 = arith.constant 0 : index
    %c0_0 = arith.constant 0 : index
    %0 = vector.load %arg1[%c0, %c0_0] : memref<2x64xf32, #tpu.memory_space<vmem>>, vector<2x64xf32>
    %1 = arith.truncf %0 : vector<2x64xf32> to vector<2x64xbf16>
    %c0_1 = arith.constant 0 : index
    %c0_2 = arith.constant 0 : index
    %2 = vector.load %arg3[%c0_1, %c0_2] : memref<64x128xbf16, #tpu.memory_space<vmem>>, vector<64x128xbf16>
    %cst = arith.constant dense<0.000000e+00> : vector<2x128xf32>
    %3 = tpu.matmul %1, %2, %cst {dimension_numbers = #tpu.dot_dimension_numbers<[1], [0], [0], [1], [0, 0, 1, 1], [], []>} : vector<2x64xbf16>, vector<64x128xbf16>, vector<2x128xf32> -> vector<2x128xf32>
    %c0_3 = arith.constant 0 : index
    %c0_4 = arith.constant 0 : index
    %4 = vector.load %arg2[%c0_3, %c0_4] : memref<2x1xf32, #tpu.memory_space<vmem>>, vector<2x1xf32>
    %c0_5 = arith.constant 0 : index
    %c0_6 = arith.constant 0 : index
    %5 = vector.load %arg4[%c0_5, %c0_6] : memref<1x128xf32, #tpu.memory_space<vmem>>, vector<1x128xf32>
    %6 = vector.broadcast %4 : vector<2x1xf32> to vector<2x128xf32>
    %7 = vector.broadcast %5 : vector<1x128xf32> to vector<2x128xf32>
    %8 = arith.mulf %6, %7 : vector<2x128xf32>
    %9 = arith.addf %3, %8 : vector<2x128xf32>
    %c0_7 = arith.constant 0 : index
    %c0_8 = arith.constant 0 : index
    %10 = vector.load %arg5[%c0_7, %c0_8] : memref<1x128xf32, #tpu.memory_space<vmem>>, vector<1x128xf32>
    %11 = vector.broadcast %10 : vector<1x128xf32> to vector<2x128xf32>
    %12 = arith.addf %9, %11 : vector<2x128xf32>
    %cst_9 = arith.constant 0.000000e+00 : f32
    %13 = vector.broadcast %cst_9 : f32 to vector<2x128xf32>
    %14 = arith.maximumf %12, %13 : vector<2x128xf32>
    %15 = arith.truncf %14 : vector<2x128xf32> to vector<2x128xbf16>
    %c0_10 = arith.constant 0 : index
    %c0_11 = arith.constant 0 : index
    %16 = vector.load %arg6[%c0_10, %c0_11] : memref<128x128xbf16, #tpu.memory_space<vmem>>, vector<128x128xbf16>
    %cst_12 = arith.constant dense<0.000000e+00> : vector<2x128xf32>
    %17 = tpu.matmul %15, %16, %cst_12 {dimension_numbers = #tpu.dot_dimension_numbers<[1], [0], [0], [1], [0, 0, 1, 1], [], []>} : vector<2x128xbf16>, vector<128x128xbf16>, vector<2x128xf32> -> vector<2x128xf32>
    %c0_13 = arith.constant 0 : index
    %c0_14 = arith.constant 0 : index
    %18 = vector.load %arg7[%c0_13, %c0_14] : memref<1x128xf32, #tpu.memory_space<vmem>>, vector<1x128xf32>
    %19 = vector.broadcast %18 : vector<1x128xf32> to vector<2x128xf32>
    %20 = arith.addf %17, %19 : vector<2x128xf32>
    %cst_15 = arith.constant 0.000000e+00 : f32
    %21 = vector.broadcast %cst_15 : f32 to vector<2x128xf32>
    %22 = arith.maximumf %20, %21 : vector<2x128xf32>
    %23 = arith.truncf %22 : vector<2x128xf32> to vector<2x128xbf16>
    %c0_16 = arith.constant 0 : index
    %c0_17 = arith.constant 0 : index
    %24 = vector.load %arg8[%c0_16, %c0_17] : memref<128x16xbf16, #tpu.memory_space<vmem>>, vector<128x16xbf16>
    %cst_18 = arith.constant dense<0.000000e+00> : vector<2x16xf32>
    %25 = tpu.matmul %23, %24, %cst_18 {dimension_numbers = #tpu.dot_dimension_numbers<[1], [0], [0], [1], [0, 0, 1, 1], [], []>} : vector<2x128xbf16>, vector<128x16xbf16>, vector<2x16xf32> -> vector<2x16xf32>
    %c0_19 = arith.constant 0 : index
    %c0_20 = arith.constant 0 : index
    %26 = vector.load %arg9[%c0_19, %c0_20] : memref<1x16xf32, #tpu.memory_space<vmem>>, vector<1x16xf32>
    %27 = vector.broadcast %26 : vector<1x16xf32> to vector<2x16xf32>
    %28 = arith.addf %25, %27 : vector<2x16xf32>
    %c0_21 = arith.constant 0 : index
    %c0_22 = arith.constant 0 : index
    %29 = vector.load %arg10[%c0_21, %c0_22] : memref<2x16xf32, #tpu.memory_space<vmem>>, vector<2x16xf32>
    tpu.vector_store %arg10[%c0_21, %c0_22], %28 {strides = array<i32>} : memref<2x16xf32, #tpu.memory_space<vmem>>, vector<2x16xf32>,
    return
  }
  func.func @transform_0(%arg0: i32) -> (i32, i32) {
    %c0_i32 = arith.constant 0 : i32
    %c0_i32_0 = arith.constant 0 : i32
    return %arg0, %c0_i32 : i32, i32
  }
  func.func @transform_1(%arg0: i32) -> (i32, i32) {
    %c0_i32 = arith.constant 0 : i32
    %c0_i32_0 = arith.constant 0 : i32
    return %arg0, %c0_i32 : i32, i32
  }
  func.func @transform_2(%arg0: i32) -> (i32, i32) {
    %c0_i32 = arith.constant 0 : i32
    %c0_i32_0 = arith.constant 0 : i32
    %c0_i32_1 = arith.constant 0 : i32
    return %c0_i32, %c0_i32_0 : i32, i32
  }
  func.func @transform_3(%arg0: i32) -> (i32, i32) {
    %c0_i32 = arith.constant 0 : i32
    %c0_i32_0 = arith.constant 0 : i32
    %c0_i32_1 = arith.constant 0 : i32
    return %c0_i32, %c0_i32_0 : i32, i32
  }
  func.func @transform_4(%arg0: i32) -> (i32, i32) {
    %c0_i32 = arith.constant 0 : i32
    %c0_i32_0 = arith.constant 0 : i32
    %c0_i32_1 = arith.constant 0 : i32
    return %c0_i32, %c0_i32_0 : i32, i32
  }
  func.func @transform_5(%arg0: i32) -> (i32, i32) {
    %c0_i32 = arith.constant 0 : i32
    %c0_i32_0 = arith.constant 0 : i32
    %c0_i32_1 = arith.constant 0 : i32
    return %c0_i32, %c0_i32_0 : i32, i32
  }
  func.func @transform_6(%arg0: i32) -> (i32, i32) {
    %c0_i32 = arith.constant 0 : i32
    %c0_i32_0 = arith.constant 0 : i32
    %c0_i32_1 = arith.constant 0 : i32
    return %c0_i32, %c0_i32_0 : i32, i32
  }
  func.func @transform_7(%arg0: i32) -> (i32, i32) {
    %c0_i32 = arith.constant 0 : i32
    %c0_i32_0 = arith.constant 0 : i32
    %c0_i32_1 = arith.constant 0 : i32
    return %c0_i32, %c0_i32_0 : i32, i32
  }
  func.func @transform_8(%arg0: i32) -> (i32, i32) {
    %c0_i32 = arith.constant 0 : i32
    %c0_i32_0 = arith.constant 0 : i32
    %c0_i32_1 = arith.constant 0 : i32
    return %c0_i32, %c0_i32_0 : i32, i32
  }
  func.func @transform_9(%arg0: i32) -> (i32, i32) {
    %c0_i32 = arith.constant 0 : i32
    %c0_i32_0 = arith.constant 0 : i32
    return %arg0, %c0_i32 : i32, i32
  }
}

</mosaic_0001>

<bundles_post_ra>
// kernel: score_four_nn_forward.1
= control target key start
LH: loop header
LB: loop body
LE: loop exit
PB: predicated region body
PF: predicated region fallthrough
CT: control target
= control target key end

     0   :  { %v525_v1 = vmov 0.0   ;;  %vm526_vm0 = vmmov 0   ;;  %v527_v3 = vmov 0   ;;  %vm82_vm1 = vcmask 523264   ;;  %s695_s0 = inlined_call_operand.vmem [shape: f32[2,64], index: 0, kind: input, shape index: {}]   ;;  %s696_s1 = inlined_call_operand.vmem [shape: f32[2,1], index: 1, kind: input, shape index: {}]   ;;  %s697_s2 = inlined_call_operand.vmem [shape: bf16[64,128], index: 2, kind: input, shape index: {}]   ;;  %s698_s3 = inlined_call_operand.vmem [shape: f32[1,128], index: 3, kind: input, shape index: {}]   ;;  %s699_s4 = inlined_call_operand.vmem [shape: f32[1,128], index: 4, kind: input, shape index: {}]   ;;  %s700_s5 = inlined_call_operand.vmem [shape: bf16[128,128], index: 5, kind: input, shape index: {}]   ;;  %s701_s6 = inlined_call_operand.vmem [shape: f32[1,128], index: 6, kind: input, shape index: {}]   ;;  %s702_s7 = inlined_call_operand.vmem [shape: bf16[128,16], index: 7, kind: input, shape index: {}]   ;;  %s703_s8 = inlined_call_operand.vmem [shape: f32[1,16], index: 8, kind: input, shape index: {}]   ;;  %s704_s9 = inlined_call_operand.hbm [shape: f32[2,16], index: 9, kind: output, shape index: {}]  }
   0x1   :  { %v481_v0 = vld [vmem:[%s697_s2] sm:$0xff]   ;;  %424 = vmatprep.subr.bf16.mxu0 %v525_v1  ;;  %436 = vmatprep.subr.bf16.mxu1 %v525_v1  ;;  %v482_v2 = vld [vmem:[%s697_s2 + $0x8] sm:$0xff]   ;;  %v483_v6 = vld [vmem:[%s697_s2 + $0x10] sm:$0xff]  }
   0x2   :  { %425 = vmatpush3.bf16.msra.mxu0 %v481_v0  ;;  %432 = vmatprep.mubr.msk.bf16.mxu0 %vm526_vm0, %v525_v1  ;;  %v44_v4 = vld [vmem:[%s696_s1] sm:$0x3]  ;;  %v486_v7 = vld [vmem:[%s700_s5 + $0x8] sm:$0xff]   ;;  %v484_v8 = vld [vmem:[%s697_s2 + $0x18] sm:$0xff]  }
   0x3   :  { %426 = vmatprep.subr.bf16.mxu0 %v525_v1  ;;  %452 = vmatprep.mubr.msk.bf16.mxu1 %vm526_vm0, %v525_v1  ;;  %v485_v5 = vld [vmem:[%s700_s5] sm:$0xff]   ;;  %v487_v10 = vld [vmem:[%s700_s5 + $0x10] sm:$0xff]   ;;  %v488_v12 = vld [vmem:[%s700_s5 + $0x18] sm:$0xff]  }
   0x4   :  { %480 = vset.pattern.permute.xlu0 %v527_v3  ;;  %437 = vmatpush3.bf16.msra.mxu1 %v485_v5  ;;  %v34_v9 = vld [vmem:[%s695_s0] sm:$0x3] }
   0x5   :  { %48 = vperm.xlu0 %480, %v44_v4   ;;  %438 = vmatprep.subr.bf16.mxu1 %v525_v1  ;;  %v35_v11 = vpack.c.bf16 %v34_v9, %v34_v9 }
   0x6   :  { %427 = vmatpush3.bf16.msra.mxu0 %v482_v2 }
   0x7   :  { %428 = vmatprep.subr.bf16.mxu0 %v525_v1 }
   0x8   :  { %439 = vmatpush3.bf16.msra.mxu1 %v486_v7 }
   0x9   :  { %440 = vmatprep.subr.bf16.mxu1 %v525_v1 }
   0xa   :  { %429 = vmatpush3.bf16.msra.mxu0 %v483_v6 }
   0xb   :  { %430 = vmatprep.subr.bf16.mxu0 %v525_v1 }
   0xc   :  { %441 = vmatpush3.bf16.msra.mxu1 %v487_v10 }
   0xd   :  { %442 = vmatprep.subr.bf16.mxu1 %v525_v1 }
   0xe   :  { %431 = vmatpush3.bf16.msra.mxu0 %v484_v8 }
   0xf   :  { %456 = vmatprep.subr.bf16.mxu0 %v525_v1 }
  0x11   :  { %433 = vmatmul.mubr.msk.bf16.vlgmr.msra.gmra.mrb[0].mxu0 %vm82_vm1, %v35_v11 }
  0x12   :  { %14 = vsyncpa [#allocation3], 0  ;;  %472 = vmatprep.mubr.msk.bf16.mxu0 %vm526_vm0, %v525_v1  ;;  %443 = vmatpush3.bf16.msra.mxu1 %v488_v12  ;;  %v489_v13 = vld [vmem:[%s700_s5 + $0x20] sm:$0xff]   ;;  %v490_v14 = vld [vmem:[%s700_s5 + $0x28] sm:$0xff]   ;;  %s528_s10 = smov [#allocation2]   ;;  %vm360_vm2 = vcmask 123904  }
  0x13   :  { %444 = vmatprep.subr.bf16.mxu1 %v525_v1  ;;  %v491_v15 = vld [vmem:[%s700_s5 + $0x30] sm:$0xff]   ;;  %v492_v16 = vld [vmem:[%s700_s5 + $0x38] sm:$0xff]   ;;  %v493_v17 = vld [vmem:[%s702_s7] sm:$0xff]   ;;  %s368_s11 = sshll.u32 %s528_s10, 4  ;;  %s369_s11 = int_to_ptr.vmem [resolvable:$true] %s368_s11 }
  0x14   :  { %457 = vmatpush3.bf16.msra.mxu0 %v493_v17  ;;  %v494_v18 = vld [vmem:[%s702_s7 + $0x8] sm:$0xff]   ;;  %v495_v19 = vld [vmem:[%s702_s7 + $0x10] sm:$0xff]   ;;  %v496_v20 = vld [vmem:[%s702_s7 + $0x18] sm:$0xff]   ;;  %p506_p1 = scmp.lt.s32.totalorder %s369_s11, %s369_s11 }
  0x15   :  { %458 = vmatprep.subr.bf16.mxu0 %v525_v1  ;;  %v497_v21 = vld [vmem:[%s702_s7 + $0x20] sm:$0xff]   ;;  %v498_v22 = vld [vmem:[%s702_s7 + $0x28] sm:$0xff]   ;;  %v499_v35 = vld [vmem:[%s702_s7 + $0x30] sm:$0xff]  }
  0x16   :  { %445 = vmatpush3.bf16.msra.mxu1 %v489_v13  ;;  %v376_v23 = vld [vmem:[%s698_s3] ss:$0 sm:$0xff]  ;;  %v500_v36 = vld [vmem:[%s702_s7 + $0x38] sm:$0xff]  }
  0x17   :  { %446 = vmatprep.subr.bf16.mxu1 %v525_v1  ;;  %v382_v27 = vld [vmem:[%s699_s4] ss:$0 sm:$0xff] }
  0x18   :  { %459 = vmatpush3.bf16.msra.mxu0 %v494_v18  ;;  %v383_v37 = vld [vmem:[%s701_s6] ss:$0 sm:$0xff]  ;;  %s501_s6 = scalar_lea.vmem %s369_s11, 32 }
  0x19   :  { %460 = vmatprep.subr.bf16.mxu0 %v525_v1  ;;  %v392_v45 = vld [vmem:[%s703_s8] ss:$0 sm:$0xff]  ;;  %p502_p0 = scmp.ne.s32.totalorder %s369_s11, %s501_s6  ;;  %p507_p2 = scmp.lt.s32.totalorder %s501_s6, %s501_s6 }
  0x1a   :  { %447 = vmatpush3.bf16.msra.mxu1 %v490_v14 }
  0x1b   :  { %448 = vmatprep.subr.bf16.mxu1 %v525_v1  ;;  %p508_p3 = por %p507_p2, %p506_p1 }
  0x1c   :  { %461 = vmatpush3.bf16.msra.mxu0 %v495_v19 }
  0x1d   :  { %462 = vmatprep.subr.bf16.mxu0 %v525_v1  ;;  %p509_p4 = pnand %p508_p3, %p502_p0 }
  0x1e   :  { %449 = vmatpush3.bf16.msra.mxu1 %v491_v15 }
  0x1f   :  { %450 = vmatprep.subr.bf16.mxu1 %v525_v1 }
  0x20   :  { %463 = vmatpush3.bf16.msra.mxu0 %v496_v20 }
  0x21   :  { %464 = vmatprep.subr.bf16.mxu0 %v525_v1 }
  0x22   :  { %451 = vmatpush3.bf16.msra.mxu1 %v492_v16 }
  0x24   :  { %465 = vmatpush3.bf16.msra.mxu0 %v497_v21 }
  0x25   :  { %466 = vmatprep.subr.bf16.mxu0 %v525_v1 }
  0x28   :  { %467 = vmatpush3.bf16.msra.mxu0 %v498_v22 }
  0x29   :  { %468 = vmatprep.subr.bf16.mxu0 %v525_v1 }
  0x2c   :  { %469 = vmatpush3.bf16.msra.mxu0 %v499_v35 }
  0x2d   :  { %470 = vmatprep.subr.bf16.mxu0 %v525_v1 }
  0x30   :  { %471 = vmatpush3.bf16.msra.mxu0 %v500_v36 }
  0x84   :  { %v49_v24 = vpop.permute.xlu0 %48 }
  0x85   :  { %v57_v25 = vmul.f32 %v376_v23, %v49_v24 }
  0xe4   :  { %v120_v26 = vpop.f32.mrb[0].mxu0 }
  0xe5   :  { %v121_v28 = vadd.f32 %v120_v26, %v57_v25  ;;  %v434_v29 = vpop.f32.mrb[1].mxu0 }
  0xe6   :  { %v123_v30 = vpop.f32.mrb[2].mxu0 }
  0xe7   :  { %v133_v31 = vadd.f32 %v382_v27, %v121_v28  ;;  %v435_v32 = vpop.f32.mrb[3].mxu0 }
  0xe9   :  { %v134_v33 = vmax.f32 %v133_v31, 0.0 }
  0xeb   :  { %v135_v34 = vpack.c.bf16 %v134_v33, %v134_v33 }
  0xed   :  { %453 = vmatmul.mubr.bf16.vlgmr.msra.gmra.mrb[0].mxu1 %v135_v34 }
 0x1c0   :  { %v241_v38 = vpop.f32.mrb[0].mxu1 }
 0x1c1   :  { %v242_v39 = vadd.f32 %v383_v37, %v241_v38  ;;  %v454_v40 = vpop.f32.mrb[1].mxu1 }
 0x1c2   :  { %v244_v41 = vpop.f32.mrb[2].mxu1 }
 0x1c3   :  { %v247_v42 = vmax.f32 %v242_v39, 0.0  ;;  %v455_v43 = vpop.f32.mrb[3].mxu1 }
 0x1c5   :  { %v248_v44 = vpack.c.bf16 %v247_v42, %v247_v42 }
 0x1c7   :  { %473 = vmatmul.mubr.bf16.vlgmr.msra.gmra.mrb[4].mxu0 %v248_v44 }
 0x29a   :  { %v354_v46 = vpop.f32.mrb[4].mxu0 }
 0x29b   :  { %v355_v47 = vadd.f32 %v392_v45, %v354_v46  ;;  %v474_v48 = vpop.f32.mrb[5].mxu0 }
 0x29c   :  { %v357_v49 = vpop.f32.mrb[6].mxu0 }
 0x29d   :  { %v475_v50 = vpop.f32.mrb[7].mxu0  ;;  %361 = vst.msk [vmem:[#allocation2] sm:$0x3] %vm360_vm2, %v355_v47 }
 0x29e   :  { %512 = shalt.err (!%p509_p4)
}
 0x29f   :  { %s513_s8 = scalar_lea.hbm %s704_s9, 32 }
 0x2a0   :  { %p514_p5 = scmp.ne.s32.totalorder %s704_s9, %s513_s8  ;;  %p517_p6 = scmp.lt.u32.totalorder %s513_s8, %s704_s9 }
 0x2a2   :  { %p519_p7 = pnand %p517_p6, %p514_p5 }
 0x2a4   :  { %522 = shalt.err (!%p519_p7)
}
 0x2a5   :  { %371 = dma.vmem_to_hbm [thread:$0]  %s369_s11, 32, %s704_s9, [#allocation3]  }
 0x2a6   :  { %523 = dma.done.wait [#allocation3], 32  }
 0x2a7   :  { %524 = vsyncadd [#allocation3], 4294967264 }
 0x2a8   :  { %375 = vsyncpa [#allocation3], 1 }

</bundles_post_ra>
